<compile_context>
chip_gen: v5e
topology: v5e:2x2
jax: 0.10.0
libtpu: 0.0.40
codegen_flags: <defaults>
</compile_context>

<pallas_src>
import functools
import math

import jax
import jax.numpy as jnp
from jax.experimental import pallas as pl
from jax.experimental.pallas import tpu as pltpu


def _round_up(x: int, m: int) -> int:
    return (x + m - 1) // m * m


def _ceil_div(a: int, b: int) -> int:
    return -(-a // b)


# ---------------------------------------------------------------------------
# Kernel
# ---------------------------------------------------------------------------
def _gaussian_policy_kernel(x_ref,      # [TB, S]     f32 state tile
                            w1_ref,     # [S, H]      compute_dtype
                            w2_ref,     # [H, H]      compute_dtype
                            wh_ref,     # [H, OUTP]   fused (mean|log_std) head
                            b12_ref,    # [2, H]      rows: b1, b2           (f32)
                            hc_ref,     # [3, OUTP]   rows: b_head, scale, bias (f32)
                            out_ref,    # [TB, OUTP]
                            *, compute_dtype):
    x = x_ref[...].astype(compute_dtype)

    # h1 = relu(x @ W1 + b1)       (f32 accumulation)
    h1 = jnp.dot(x, w1_ref[...], preferred_element_type=jnp.float32)
    h1 = jnp.maximum(h1 + b12_ref[0:1, :], 0.0)

    # h2 = relu(h1 @ W2 + b2)
    h2 = jnp.dot(h1.astype(compute_dtype), w2_ref[...],
                 preferred_element_type=jnp.float32)
    h2 = jnp.maximum(h2 + b12_ref[1:2, :], 0.0)

    # fused heads: [mean | log_std] = scale * tanh(h2 @ W_head + b_head) + bias
    y = jnp.dot(h2.astype(compute_dtype), wh_ref[...],
                preferred_element_type=jnp.float32)
    y = hc_ref[1:2, :] * jnp.tanh(y + hc_ref[0:1, :]) + hc_ref[2:3, :]

    out_ref[...] = y.astype(out_ref.dtype)


# ---------------------------------------------------------------------------
# One-time parameter packing (hoisted out of the per-step hot path)
# ---------------------------------------------------------------------------
def prepare_params(params, *, compute_dtype=jnp.bfloat16):
    """Pack raw GaussianPolicy params into kernel-ready arrays. Call once."""
    S, H = params["w1"].shape
    A = params["wm"].shape[1]
    OUTP = _round_up(max(2 * A, 128), 128)          # lane-dense output slab width
    pad = OUTP - 2 * A

    w_head = jnp.concatenate([params["wm"], params["ws"]], axis=1)
    w_head = jnp.pad(w_head, ((0, 0), (0, pad)))
    b_head = jnp.pad(jnp.concatenate([params["bm"], params["bs"]], axis=1),
                     ((0, 0), (0, pad)))
    scale = jnp.pad(jnp.concatenate(
        [jnp.full((1, A), params["action_scale"], jnp.float32),
         jnp.full((1, A), params["log_std_scale"], jnp.float32)], axis=1),
        ((0, 0), (0, pad)))
    bias = jnp.pad(jnp.concatenate(
        [jnp.full((1, A), params["action_bias"], jnp.float32),
         jnp.full((1, A), params["log_std_bias"], jnp.float32)], axis=1),
        ((0, 0), (0, pad)))

    return {
        "w1": params["w1"].astype(compute_dtype),
        "w2": params["w2"].astype(compute_dtype),
        "w_head": w_head.astype(compute_dtype),
        "b12": jnp.concatenate([params["b1"], params["b2"]], axis=0),   # [2,H] f32
        "hc": jnp.concatenate([b_head, scale, bias], axis=0),           # [3,OUTP] f32
        "state_dim": S, "hidden_dim": H, "action_dim": A, "out_pad": OUTP,
        "compute_dtype": compute_dtype,
    }


# ---------------------------------------------------------------------------
# Tiling / VMEM helpers
# ---------------------------------------------------------------------------
def _choose_tiling(B: int, block_batch: int):
    """Pick batch tile TB minimizing padding; keep >=2 grid steps when the
    batch is big enough so both v7x TensorCores get work."""
    B8 = _round_up(B, 8)
    if B8 > block_batch:
        n_steps = _ceil_div(B, block_batch)
    elif B8 >= 512:
        n_steps = 2
    else:
        n_steps = 1
    TB = min(block_batch, _round_up(_ceil_div(B, n_steps), 8))
    B_pad = _round_up(B, TB)
    return TB, B_pad


def _vmem_estimate_bytes(TB, S, H, OUTP, compute_dtype, out_dtype):
    cb = jnp.dtype(compute_dtype).itemsize
    ob = jnp.dtype(out_dtype).itemsize
    tiles = 2 * TB * S * 4 + 2 * TB * OUTP * ob          # double-buffered x / out
    weights = 2 * (S * H + H * H + H * OUTP) * cb        # conservatively 2x
    consts = 2 * (2 * H + 3 * OUTP) * 4
    temps = 2 * TB * H * 4 + TB * (S + 2 * H) * cb       # h1/h2 f32 + cast copies
    return tiles + weights + consts + temps


# ---------------------------------------------------------------------------
# Forward
# ---------------------------------------------------------------------------
def gaussian_policy_forward(state, packed, *, block_batch=2048, out_dtype=None):
    """Pallas-backed GaussianPolicy.forward. Returns (mean, log_std) as f32."""
    B, S = state.shape
    H = packed["hidden_dim"]
    A = packed["action_dim"]
    OUTP = packed["out_pad"]
    compute_dtype = packed["compute_dtype"]
    assert S == packed["state_dim"]

    if out_dtype is None:
        # bf16 output slab halves the dominant writeback stream on the bf16 path.
        out_dtype = (compute_dtype
                     if jnp.dtype(compute_dtype).itemsize < 4 else jnp.float32)

    TB, B_pad = _choose_tiling(B, block_batch)
    x = state if B_pad == B else jnp.pad(state, ((0, B_pad - B), (0, 0)))
    grid = (B_pad // TB,)

    # Raise scoped VMEM only when the chosen tile needs it; cap at v7x physical.
    est = _vmem_estimate_bytes(TB, S, H, OUTP, compute_dtype, out_dtype)
    vmem_limit = None
    if est > 16 * 1024 * 1024:
        vmem_limit = min(int(est * 1.3), 64 * 1024 * 1024)

    cb = jnp.dtype(compute_dtype).itemsize
    cost = pl.CostEstimate(
        flops=2 * B_pad * (S * H + H * H + H * OUTP),
        transcendentals=B_pad * OUTP,
        bytes_accessed=(B_pad * S * 4
                        + (S * H + H * H + H * OUTP) * cb
                        + (2 * H + 3 * OUTP) * 4
                        + B_pad * OUTP * jnp.dtype(out_dtype).itemsize),
    )

    out = pl.pallas_call(
        functools.partial(_gaussian_policy_kernel, compute_dtype=compute_dtype),
        out_shape=jax.ShapeDtypeStruct((B_pad, OUTP), out_dtype),
        grid=grid,
        in_specs=[
            pl.BlockSpec((TB, S), lambda i: (i, 0)),       # state tile (pipelined)
            pl.BlockSpec((S, H), lambda i: (0, 0)),        # W1   (VMEM-resident)
            pl.BlockSpec((H, H), lambda i: (0, 0)),        # W2   (VMEM-resident)
            pl.BlockSpec((H, OUTP), lambda i: (0, 0)),     # fused head weights
            pl.BlockSpec((2, H), lambda i: (0, 0)),        # [b1; b2]
            pl.BlockSpec((3, OUTP), lambda i: (0, 0)),     # [b_head; scale; bias]
        ],
        out_specs=pl.BlockSpec((TB, OUTP), lambda i: (i, 0)),
        compiler_params=pltpu.CompilerParams(
            dimension_semantics=("parallel",),
            vmem_limit_bytes=vmem_limit),
        cost_estimate=cost,
    )(x, packed["w1"], packed["w2"], packed["w_head"], packed["b12"],
      packed["hc"])

    mean = out[:B, :A].astype(jnp.float32)
    log_std = out[:B, A:2 * A].astype(jnp.float32)
    return mean, log_std


# ---------------------------------------------------------------------------
# PyTorch-equivalent init + pure-JAX reference
# ---------------------------------------------------------------------------
def init_gaussian_policy_params(key, state_dim, action_dim, hidden_dim=256,
                                action_space=None,
                                log_std_min=-1.6, log_std_max=0.0):
    """PyTorch-style init: xavier_uniform_(gain=1) weights, zero biases."""
    def xavier_linear(k, fan_in, fan_out):
        bound = math.sqrt(6.0 / (fan_in + fan_out))
        # stored as [in, out] so the kernel computes x @ W + b
        w = jax.random.uniform(k, (fan_in, fan_out), jnp.float32, -bound, bound)
        b = jnp.zeros((1, fan_out), jnp.float32)
        return w, b

    k1, k2, k3, k4 = jax.random.split(key, 4)
    w1, b1 = xavier_linear(k1, state_dim, hidden_dim)
    w2, b2 = xavier_linear(k2, hidden_dim, hidden_dim)
    wm, bm = xavier_linear(k3, hidden_dim, action_dim)
    ws, bs = xavier_linear(k4, hidden_dim, action_dim)

    if action_space is None:
        action_scale, action_bias = 1.0, 0.0
    else:
        low, high = action_space
        action_scale = float((high - low) / 2.0)
        action_bias = float((high + low) / 2.0)

    # TODO(synk): sample()/evaluate_actions() (Normal.rsample, log_prob, entropy)
    # are host-side RNG/distribution logic and are not implemented in the kernel.
    return {
        "w1": w1, "b1": b1,
        "w2": w2, "b2": b2,
        "wm": wm, "bm": bm,
        "ws": ws, "bs": bs,
        "action_scale": action_scale, "action_bias": action_bias,
        "log_std_scale": (log_std_max - log_std_min) / 2.0,
        "log_std_bias": (log_std_max + log_std_min) / 2.0,
    }


def gaussian_policy_forward_ref(state, p):
    """Pure-JAX reference (matches GaussianPolicy.forward)."""
    h1 = jax.nn.relu(state @ p["w1"] + p["b1"])
    h2 = jax.nn.relu(h1 @ p["w2"] + p["b2"])
    mean = p["action_scale"] * jnp.tanh(h2 @ p["wm"] + p["bm"]) + p["action_bias"]
    log_std = (p["log_std_scale"] * jnp.tanh(h2 @ p["ws"] + p["bs"])
               + p["log_std_bias"])
    return mean, log_std


if __name__ == "__main__":
    key = jax.random.PRNGKey(0)
    k_params, k_state, k_state2 = jax.random.split(key, 3)

    batch, state_dim, action_dim, hidden_dim = 8, 16, 4, 128

    params = init_gaussian_policy_params(k_params, state_dim, action_dim,
                                         hidden_dim,
                                         log_std_min=-1.6, log_std_max=0.0)
    state = jax.random.normal(k_state, (batch, state_dim), dtype=jnp.float32)
    mean_ref, log_std_ref = gaussian_policy_forward_ref(state, params)

    # --- f32 path: tight correctness check, single grid step -------------
    packed_f32 = prepare_params(params, compute_dtype=jnp.float32)
    mean, log_std = gaussian_policy_forward(state, packed_f32)
    jax.block_until_ready((mean, log_std))
    assert mean.shape == (batch, action_dim)
    assert log_std.shape == (batch, action_dim)
    assert jnp.allclose(mean, mean_ref, atol=1e-4, rtol=1e-4)
    assert jnp.allclose(log_std, log_std_ref, atol=1e-4, rtol=1e-4)

    # --- ragged batch: exercises multi-step grid + batch padding ---------
    state2 = jax.random.normal(k_state2, (300, state_dim), dtype=jnp.float32)
    mean2, log_std2 = gaussian_policy_forward(state2, packed_f32,
                                              block_batch=128)
    jax.block_until_ready((mean2, log_std2))
    mean2_ref, log_std2_ref = gaussian_policy_forward_ref(state2, params)
    assert mean2.shape == (300, action_dim)
    assert jnp.allclose(mean2, mean2_ref, atol=1e-4, rtol=1e-4)
    assert jnp.allclose(log_std2, log_std2_ref, atol=1e-4, rtol=1e-4)

    # --- default bf16 MXU path (f32 accumulation, bf16 output slab) ------
    packed_bf16 = prepare_params(params)          # compute_dtype=bf16 default
    mean_bf, log_std_bf = gaussian_policy_forward(state, packed_bf16)
    jax.block_until_ready((mean_bf, log_std_bf))
    assert jnp.allclose(mean_bf, mean_ref, atol=1e-1)
    assert jnp.allclose(log_std_bf, log_std_ref, atol=1e-1)

    print("KERNEL_OK")
</pallas_src>

<mosaic_0001>
module attributes {stable_mosaic.version = 11 : i64} {
  func.func @_gaussian_policy_kernel(%arg0: i32, %arg1: memref<8x16xf32, #tpu.memory_space<vmem>>, %arg2: memref<16x128xf32, #tpu.memory_space<vmem>>, %arg3: memref<128x128xf32, #tpu.memory_space<vmem>>, %arg4: memref<128x128xf32, #tpu.memory_space<vmem>>, %arg5: memref<2x128xf32, #tpu.memory_space<vmem>>, %arg6: memref<3x128xf32, #tpu.memory_space<vmem>>, %arg7: memref<8x128xf32, #tpu.memory_space<vmem>>) attributes {dimension_semantics = [#tpu.dimension_semantics<parallel>], iteration_bounds = array<i64: 1>, scalar_prefetch = 0 : i64, scratch_operands = 0 : i64, tpu.core_type = #tpu.core_type<tc>, window_params = [{transform_indices = @transform_0, window_bounds = array<i64: 8, 16>}, {pipeline_mode = #tpu.pipeline_mode<synchronous>, transform_indices = @transform_1, window_bounds = array<i64: 16, 128>}, {pipeline_mode = #tpu.pipeline_mode<synchronous>, transform_indices = @transform_2, window_bounds = array<i64: 128, 128>}, {pipeline_mode = #tpu.pipeline_mode<synchronous>, transform_indices = @transform_3, window_bounds = array<i64: 128, 128>}, {pipeline_mode = #tpu.pipeline_mode<synchronous>, transform_indices = @transform_4, window_bounds = array<i64: 2, 128>}, {pipeline_mode = #tpu.pipeline_mode<synchronous>, transform_indices = @transform_5, window_bounds = array<i64: 3, 128>}, {transform_indices = @transform_6, window_bounds = array<i64: 8, 128>}]} {
    %c0 = arith.constant 0 : index
    %c0_0 = arith.constant 0 : index
    %0 = vector.load %arg1[%c0, %c0_0] : memref<8x16xf32, #tpu.memory_space<vmem>>, vector<8x16xf32>
    %c0_1 = arith.constant 0 : index
    %c0_2 = arith.constant 0 : index
    %1 = vector.load %arg2[%c0_1, %c0_2] : memref<16x128xf32, #tpu.memory_space<vmem>>, vector<16x128xf32>
    %cst = arith.constant dense<0.000000e+00> : vector<8x128xf32>
    %2 = tpu.matmul %0, %1, %cst {dimension_numbers = #tpu.dot_dimension_numbers<[1], [0], [0], [1], [0, 0, 1, 1], [], []>} : vector<8x16xf32>, vector<16x128xf32>, vector<8x128xf32> -> vector<8x128xf32>
    %c0_3 = arith.constant 0 : index
    %c0_4 = arith.constant 0 : index
    %3 = vector.load %arg5[%c0_3, %c0_4] : memref<2x128xf32, #tpu.memory_space<vmem>>, vector<1x128xf32>
    %4 = vector.broadcast %3 : vector<1x128xf32> to vector<8x128xf32>
    %5 = arith.addf %2, %4 : vector<8x128xf32>
    %cst_5 = arith.constant 0.000000e+00 : f32
    %6 = vector.broadcast %cst_5 : f32 to vector<8x128xf32>
    %7 = arith.maximumf %5, %6 : vector<8x128xf32>
    %c0_6 = arith.constant 0 : index
    %c0_7 = arith.constant 0 : index
    %8 = vector.load %arg3[%c0_6, %c0_7] : memref<128x128xf32, #tpu.memory_space<vmem>>, vector<128x128xf32>
    %cst_8 = arith.constant dense<0.000000e+00> : vector<8x128xf32>
    %9 = tpu.matmul %7, %8, %cst_8 {dimension_numbers = #tpu.dot_dimension_numbers<[1], [0], [0], [1], [0, 0, 1, 1], [], []>} : vector<8x128xf32>, vector<128x128xf32>, vector<8x128xf32> -> vector<8x128xf32>
    %c1 = arith.constant 1 : index
    %c0_9 = arith.constant 0 : index
    %10 = vector.load %arg5[%c1, %c0_9] : memref<2x128xf32, #tpu.memory_space<vmem>>, vector<1x128xf32>
    %11 = vector.broadcast %10 : vector<1x128xf32> to vector<8x128xf32>
    %12 = arith.addf %9, %11 : vector<8x128xf32>
    %cst_10 = arith.constant 0.000000e+00 : f32
    %13 = vector.broadcast %cst_10 : f32 to vector<8x128xf32>
    %14 = arith.maximumf %12, %13 : vector<8x128xf32>
    %c0_11 = arith.constant 0 : index
    %c0_12 = arith.constant 0 : index
    %15 = vector.load %arg4[%c0_11, %c0_12] : memref<128x128xf32, #tpu.memory_space<vmem>>, vector<128x128xf32>
    %cst_13 = arith.constant dense<0.000000e+00> : vector<8x128xf32>
    %16 = tpu.matmul %14, %15, %cst_13 {dimension_numbers = #tpu.dot_dimension_numbers<[1], [0], [0], [1], [0, 0, 1, 1], [], []>} : vector<8x128xf32>, vector<128x128xf32>, vector<8x128xf32> -> vector<8x128xf32>
    %c1_14 = arith.constant 1 : index
    %c0_15 = arith.constant 0 : index
    %17 = vector.load %arg6[%c1_14, %c0_15] : memref<3x128xf32, #tpu.memory_space<vmem>>, vector<1x128xf32>
    %c0_16 = arith.constant 0 : index
    %c0_17 = arith.constant 0 : index
    %18 = vector.load %arg6[%c0_16, %c0_17] : memref<3x128xf32, #tpu.memory_space<vmem>>, vector<1x128xf32>
    %19 = vector.broadcast %18 : vector<1x128xf32> to vector<8x128xf32>
    %20 = arith.addf %16, %19 : vector<8x128xf32>
    %21 = math.tanh %20 : vector<8x128xf32>
    %22 = vector.broadcast %17 : vector<1x128xf32> to vector<8x128xf32>
    %23 = arith.mulf %22, %21 : vector<8x128xf32>
    %c2 = arith.constant 2 : index
    %c0_18 = arith.constant 0 : index
    %24 = vector.load %arg6[%c2, %c0_18] : memref<3x128xf32, #tpu.memory_space<vmem>>, vector<1x128xf32>
    %25 = vector.broadcast %24 : vector<1x128xf32> to vector<8x128xf32>
    %26 = arith.addf %23, %25 : vector<8x128xf32>
    %c0_19 = arith.constant 0 : index
    %c0_20 = arith.constant 0 : index
    %27 = vector.load %arg7[%c0_19, %c0_20] : memref<8x128xf32, #tpu.memory_space<vmem>>, vector<8x128xf32>
    tpu.vector_store %arg7[%c0_19, %c0_20], %26 {strides = array<i32>} : memref<8x128xf32, #tpu.memory_space<vmem>>, vector<8x128xf32>,
    return
  }
  func.func @transform_0(%arg0: i32) -> (i32, i32) {
    %c0_i32 = arith.constant 0 : i32
    %c0_i32_0 = arith.constant 0 : i32
    return %arg0, %c0_i32 : i32, i32
  }
  func.func @transform_1(%arg0: i32) -> (i32, i32) {
    %c0_i32 = arith.constant 0 : i32
    %c0_i32_0 = arith.constant 0 : i32
    %c0_i32_1 = arith.constant 0 : i32
    return %c0_i32, %c0_i32_0 : i32, i32
  }
  func.func @transform_2(%arg0: i32) -> (i32, i32) {
    %c0_i32 = arith.constant 0 : i32
    %c0_i32_0 = arith.constant 0 : i32
    %c0_i32_1 = arith.constant 0 : i32
    return %c0_i32, %c0_i32_0 : i32, i32
  }
  func.func @transform_3(%arg0: i32) -> (i32, i32) {
    %c0_i32 = arith.constant 0 : i32
    %c0_i32_0 = arith.constant 0 : i32
    %c0_i32_1 = arith.constant 0 : i32
    return %c0_i32, %c0_i32_0 : i32, i32
  }
  func.func @transform_4(%arg0: i32) -> (i32, i32) {
    %c0_i32 = arith.constant 0 : i32
    %c0_i32_0 = arith.constant 0 : i32
    %c0_i32_1 = arith.constant 0 : i32
    return %c0_i32, %c0_i32_0 : i32, i32
  }
  func.func @transform_5(%arg0: i32) -> (i32, i32) {
    %c0_i32 = arith.constant 0 : i32
    %c0_i32_0 = arith.constant 0 : i32
    %c0_i32_1 = arith.constant 0 : i32
    return %c0_i32, %c0_i32_0 : i32, i32
  }
  func.func @transform_6(%arg0: i32) -> (i32, i32) {
    %c0_i32 = arith.constant 0 : i32
    %c0_i32_0 = arith.constant 0 : i32
    return %arg0, %c0_i32 : i32, i32
  }
}

</mosaic_0001>

<bundles_post_ra>
// kernel: tpu_custom_call.1
= control target key start
LH: loop header
LB: loop body
LE: loop exit
PB: predicated region body
PF: predicated region fallthrough
CT: control target
= control target key end

     0   :  { %11 = vsyncpa [#allocation3], 0  ;;  %s470_s0 = inlined_call_operand.hbm [shape: f32[8,16], index: 0, kind: input, shape index: {}]   ;;  %s471_s1 = inlined_call_operand.hbm [shape: f32[16,128], index: 1, kind: input, shape index: {}]   ;;  %s472_s2 = inlined_call_operand.hbm [shape: f32[128,128], index: 2, kind: input, shape index: {}]   ;;  %s473_s3 = inlined_call_operand.hbm [shape: f32[128,128], index: 3, kind: input, shape index: {}]   ;;  %s474_s4 = inlined_call_operand.hbm [shape: f32[2,128], index: 4, kind: input, shape index: {}]   ;;  %s475_s5 = inlined_call_operand.vmem [shape: f32[3,128], index: 5, kind: input, shape index: {}]   ;;  %s476_s6 = inlined_call_operand.hbm [shape: f32[8,128], index: 6, kind: output, shape index: {}]  }
   0x1   :  { %12 = vsyncpa [#allocation6], 0 }
   0x2   :  { %13 = vsyncpa [#allocation9], 0  ;;  %s30_s23 = sshll.u32 %s471_s1, 4  ;;  %s31_s23 = int_to_ptr.hbm [resolvable:$true] %s30_s23 }
   0x3   :  { %14 = vsyncpa [#allocation4], 0  ;;  %s400_s24 = smov [#allocation5]   ;;  %s56_s28 = sshll.u32 %s473_s3, 4  ;;  %s57_s28 = int_to_ptr.hbm [resolvable:$true] %s56_s28 }
   0x4   :  { %s32_s25 = sshll.u32 %s400_s24, 4  ;;  %s401_s29 = smov 128   ;;  %s33_s25 = int_to_ptr.vmem [resolvable:$true] %s32_s25 }
   0x5   :  { %s402_s30 = smov 8   ;;  %s403_s7 = smov [#allocation8]  }
   0x6   :  { %38 = dma.hbm_to_vmem [thread:$0]  %s31_s23, 256, %s33_s25, [#allocation6], %s401_s29, %s401_s29, %s402_s30  }
   0x7   :  { %s58_s8 = sshll.u32 %s403_s7, 4  ;;  %s20_s11 = sshll.u32 %s470_s0, 4  ;;  %s59_s8 = int_to_ptr.vmem [resolvable:$true] %s58_s8  ;;  %s21_s11 = int_to_ptr.hbm [resolvable:$true] %s20_s11 }
   0x8   :  { %64 = dma.hbm_to_vmem [thread:$0]  %s57_s28, 2048, %s59_s8, [#allocation9], %s401_s29, %s401_s29, %s402_s30  }
   0x9   :  { %s43_s13 = sshll.u32 %s472_s2, 4  ;;  %s404_s14 = smov [#allocation2]   ;;  %s44_s13 = int_to_ptr.hbm [resolvable:$true] %s43_s13 }
   0xa   :  { %s22_s15 = sshll.u32 %s404_s14, 4  ;;  %s405_s3 = smov [#allocation7]   ;;  %s23_s15 = int_to_ptr.vmem [resolvable:$true] %s22_s15 }
   0xb   :  { %25 = dma.hbm_to_vmem [thread:$0]  %s21_s11, 128, %s23_s15, [#allocation3]  }
   0xc   :  { %s45_s16 = sshll.u32 %s405_s3, 4  ;;  %s70_s19 = sshll.u32 %s474_s4, 4  ;;  %s46_s16 = int_to_ptr.vmem [resolvable:$true] %s45_s16  ;;  %s71_s19 = int_to_ptr.hbm [resolvable:$true] %s70_s19 }
   0xd   :  { %51 = dma.hbm_to_vmem [thread:$0]  %s44_s13, 2048, %s46_s16, [#allocation6], %s401_s29, %s401_s29, %s402_s30  }
   0xe   :  { %s406_s0 = smov [#allocation10]  }
   0xf   :  { %s72_s20 = sshll.u32 %s406_s0, 4  ;;  %s73_s20 = int_to_ptr.vmem [resolvable:$true] %s72_s20 }
  0x10   :  { %75 = dma.hbm_to_vmem [thread:$0]  %s71_s19, 32, %s73_s20, [#allocation9]  }
  0x11   :  { %392 = dma.done.wait [#allocation3], 128  }
  0x12   :  { %393 = vsyncadd [#allocation3], 4294967168 }
  0x13   :  { %394 = dma.done.wait [#allocation6], 2304  }
  0x14   :  { %395 = vsyncadd [#allocation6], 4294964992 }
  0x15   :  { %396 = dma.done.wait [#allocation9], 2080  }
  0x16   :  { %397 = vsyncadd [#allocation9], 4294965216  ;;  %v100_v0 = vld [vmem:[#allocation5 + $0x8] sm:$0xff]  ;;  %v99_v1 = vld [vmem:[#allocation5] sm:$0xff]  ;;  %vm103_vm0 = vcmask 130048   ;;  %s407_s25 = smov [#allocation11]  }
  0x17   :  { %121 = vmatpush.msra.mxu0 %v100_v0  ;;  %v98_v2 = vld [vmem:[#allocation2] sm:$0xff]  ;;  %v143_v3 = vld [vmem:[#allocation7 + $0x78] sm:$0xff]  ;;  %v142_v4 = vld [vmem:[#allocation7 + $0x70] sm:$0xff]  ;;  %s218_s26 = sshll.u32 %s407_s25, 4  ;;  %s220_s29 = sshll.u32 %s476_s6, 4  ;;  %s219_s26 = int_to_ptr.vmem [resolvable:$true] %s218_s26  ;;  %s221_s29 = int_to_ptr.hbm [resolvable:$true] %s220_s29 }
  0x18   :  { %146 = vmatpush.msra.mxu1 %v143_v3  ;;  %v141_v5 = vld [vmem:[#allocation7 + $0x68] sm:$0xff]  ;;  %v140_v6 = vld [vmem:[#allocation7 + $0x60] sm:$0xff]  ;;  %v139_v7 = vld [vmem:[#allocation7 + $0x58] sm:$0xff] }
  0x19   :  { %122 = vmatpush.msra.mxu0 %v99_v1  ;;  %v138_v8 = vld [vmem:[#allocation7 + $0x50] sm:$0xff]  ;;  %v137_v9 = vld [vmem:[#allocation7 + $0x48] sm:$0xff]  ;;  %v136_v10 = vld [vmem:[#allocation7 + $0x40] sm:$0xff] }
  0x1a   :  { %232 = vmatmul.msk.f32.vlgmr.msra.gmra.mxu0 %vm103_vm0, %v98_v2  ;;  %147 = vmatpush.msra.mxu1 %v142_v4  ;;  %v135_v11 = vld [vmem:[#allocation7 + $0x38] sm:$0xff]  ;;  %v134_v12 = vld [vmem:[#allocation7 + $0x30] sm:$0xff]  ;;  %v133_v13 = vld [vmem:[#allocation7 + $0x28] sm:$0xff] }
  0x1b   :  { %v132_v14 = vld [vmem:[#allocation7 + $0x20] sm:$0xff]  ;;  %v131_v15 = vld [vmem:[#allocation7 + $0x18] sm:$0xff]  ;;  %v130_v16 = vld [vmem:[#allocation7 + $0x10] sm:$0xff] }
  0x1c   :  { %148 = vmatpush.msra.mxu1 %v141_v5  ;;  %v129_v17 = vld [vmem:[#allocation7 + $0x8] sm:$0xff]  ;;  %v128_v18 = vld [vmem:[#allocation7] sm:$0xff]  ;;  %v182_v19 = vld [vmem:[#allocation8 + $0x78] sm:$0xff] }
  0x1d   :  { %v181_v20 = vld [vmem:[#allocation8 + $0x70] sm:$0xff]  ;;  %186 = vmatpush.msra.mxu2 %v182_v19  ;;  %v180_v21 = vld [vmem:[#allocation8 + $0x68] sm:$0xff]  ;;  %v179_v22 = vld [vmem:[#allocation8 + $0x60] sm:$0xff] }
  0x1e   :  { %149 = vmatpush.msra.mxu1 %v140_v6  ;;  %v178_v23 = vld [vmem:[#allocation8 + $0x58] sm:$0xff]  ;;  %v177_v24 = vld [vmem:[#allocation8 + $0x50] sm:$0xff]  ;;  %v176_v25 = vld [vmem:[#allocation8 + $0x48] sm:$0xff] }
  0x1f   :  { %187 = vmatpush.msra.mxu2 %v181_v20  ;;  %v175_v26 = vld [vmem:[#allocation8 + $0x40] sm:$0xff]  ;;  %v174_v27 = vld [vmem:[#allocation8 + $0x38] sm:$0xff]  ;;  %v173_v28 = vld [vmem:[#allocation8 + $0x30] sm:$0xff] }
  0x20   :  { %150 = vmatpush.msra.mxu1 %v139_v7  ;;  %v172_v29 = vld [vmem:[#allocation8 + $0x28] sm:$0xff]  ;;  %v171_v30 = vld [vmem:[#allocation8 + $0x20] sm:$0xff]  ;;  %v170_v31 = vld [vmem:[#allocation8 + $0x18] sm:$0xff] }
  0x21   :  { %188 = vmatpush.msra.mxu2 %v180_v21  ;;  %v241_v32 = vld [vmem:[#allocation10] ss:$0 sm:$0xff]  ;;  %v169_v36 = vld [vmem:[#allocation8 + $0x10] sm:$0xff]  ;;  %v168_v37 = vld [vmem:[#allocation8 + $0x8] sm:$0xff] }
  0x22   :  { %151 = vmatpush.msra.mxu1 %v138_v8  ;;  %v167_v38 = vld [vmem:[#allocation8] sm:$0xff]  ;;  %v243_v43 = vld [vmem:[%s475_s5] ss:$0 sm:$0xff]  ;;  %v244_v46 = vld [vmem:[%s475_s5 + $0x1] ss:$0 sm:$0xff] }
  0x23   :  { %189 = vmatpush.msra.mxu2 %v179_v22  ;;  %v242_v39 = vld [vmem:[#allocation10 + $0x1] ss:$0 sm:$0xff]  ;;  %v245_v47 = vld [vmem:[%s475_s5 + $0x2] ss:$0 sm:$0xff] }
  0x24   :  { %152 = vmatpush.msra.mxu1 %v137_v9 }
  0x25   :  { %190 = vmatpush.msra.mxu2 %v178_v23 }
  0x26   :  { %153 = vmatpush.msra.mxu1 %v136_v10 }
  0x27   :  { %191 = vmatpush.msra.mxu2 %v177_v24 }
  0x28   :  { %154 = vmatpush.msra.mxu1 %v135_v11 }
  0x29   :  { %192 = vmatpush.msra.mxu2 %v176_v25 }
  0x2a   :  { %155 = vmatpush.msra.mxu1 %v134_v12 }
  0x2b   :  { %193 = vmatpush.msra.mxu2 %v175_v26 }
  0x2c   :  { %156 = vmatpush.msra.mxu1 %v133_v13 }
  0x2d   :  { %194 = vmatpush.msra.mxu2 %v174_v27 }
  0x2e   :  { %157 = vmatpush.msra.mxu1 %v132_v14 }
  0x2f   :  { %195 = vmatpush.msra.mxu2 %v173_v28 }
  0x30   :  { %158 = vmatpush.msra.mxu1 %v131_v15 }
  0x31   :  { %196 = vmatpush.msra.mxu2 %v172_v29 }
  0x32   :  { %159 = vmatpush.msra.mxu1 %v130_v16 }
  0x33   :  { %197 = vmatpush.msra.mxu2 %v171_v30 }
  0x34   :  { %160 = vmatpush.msra.mxu1 %v129_v17 }
  0x35   :  { %198 = vmatpush.msra.mxu2 %v170_v31 }
  0x36   :  { %161 = vmatpush.msra.mxu1 %v128_v18 }
  0x37   :  { %199 = vmatpush.msra.mxu2 %v169_v36 }
  0x39   :  { %200 = vmatpush.msra.mxu2 %v168_v37 }
  0x3b   :  { %201 = vmatpush.msra.mxu2 %v167_v38 }
  0x97   :  { %v124_v33 = vpop.f32.mrf.mxu0 }
  0x98   :  { %v125_v34 = vadd.f32 %v241_v32, %v124_v33 }
  0x9a   :  { %v127_v35 = vmax.f32 %v125_v34, 0.0 }
  0x9c   :  { %162 = vmatmul.f32.vlgmr.msra.gmra.mxu1 %v127_v35 }
 0x119   :  { %v163_v40 = vpop.f32.mrf.mxu1 }
 0x11a   :  { %v164_v41 = vadd.f32 %v242_v39, %v163_v40 }
 0x11c   :  { %v166_v42 = vmax.f32 %v164_v41, 0.0 }
 0x11e   :  { %202 = vmatmul.f32.vlgmr.msra.gmra.mxu2 %v166_v42 }
 0x1a1   :  { %v203_v44 = vpop.f32.mrf.mxu2 }
 0x1a2   :  { %v204_v45 = vadd.f32 %v243_v43, %v203_v44 }
 0x1a4   :  { %246 = vtanh.f32 %v204_v45 }
 0x1aa   :  { %v247_v48 = vpop.eup %246 }
 0x1ab   :  { %v208_v49 = vmul.f32 %v247_v48, %v244_v46 }
 0x1ad   :  { %v211_v50 = vadd.f32 %v245_v47, %v208_v49 }
 0x1af   :  { %212 = vst [vmem:[#allocation11] sm:$0xff] %v211_v50 }
 0x1b0   :  { %223 = dma.vmem_to_hbm [thread:$0]  %s219_s26, 128, %s221_s29, [#allocation4]  }
 0x1b1   :  { %398 = dma.done.wait [#allocation4], 128  }
 0x1b2   :  { %399 = vsyncadd [#allocation4], 4294967168 }
 0x1b3   :  { %228 = vsyncpa [#allocation3], 1 }
 0x1b4   :  { %229 = vsyncpa [#allocation6], 1 }
 0x1b5   :  { %230 = vsyncpa [#allocation9], 1 }
 0x1b6   :  { %231 = vsyncpa [#allocation4], 1 }

</bundles_post_ra>
